<compile_context>
chip_gen: v6e
topology: v6e:2x2x1
jax: 0.10.0
libtpu: 0.0.40
codegen_flags: <defaults>
</compile_context>

<pallas_src>
import functools

import jax
import jax.numpy as jnp
from jax.experimental import pallas as pl
from jax.experimental.pallas import tpu as pltpu


def _round_up(x, m):
    return (x + m - 1) // m * m


def _ssd_loss_kernel(scores_ref, labels_ref, locs_ref, boxes_ref,   # inputs
                     out_ref,                                        # output
                     ce_ref, pos_acc, cemax_acc, sl1_acc,            # scratch
                     *, n_orig, tile_n, n_tiles, num_classes, batch,
                     num_coords, loc_w, conf_w, ratio, bisect_iters):
    n = pl.program_id(1)

    # ---- reset per-batch-row vector accumulators -------------------------------
    @pl.when(n == 0)
    def _init():
        pos_acc[...] = jnp.zeros_like(pos_acc)
        cemax_acc[...] = jnp.zeros_like(cemax_acc)
        sl1_acc[...] = jnp.zeros_like(sl1_acc)

    # ---- localization: smooth-L1 partial on a lane-dense (1, 4*T) slab ---------
    # Ragged tail is masked in-kernel (no wrapper pad); NaN/Inf garbage in the
    # stale tail lanes is killed by the select.
    d = locs_ref[0].astype(jnp.float32) - boxes_ref[0].astype(jnp.float32)
    ad = jnp.abs(d)
    sl1 = jnp.where(ad < 1.0, 0.5 * d * d, ad - 0.5)
    flat_idx = n * (num_coords * tile_n) + jax.lax.broadcasted_iota(
        jnp.int32, (1, num_coords * tile_n), 1)
    sl1 = jnp.where(flat_idx < n_orig * num_coords, sl1, jnp.float32(0.0))
    sl1_acc[...] += sl1                                             # vector acc

    # ---- per-prior cross-entropy on the class-major (C, T) tile ----------------
    prior_idx = n * tile_n + jax.lax.broadcasted_iota(jnp.int32, (1, tile_n), 1)
    valid = prior_idx < n_orig                                      # (1, T)
    scores = jnp.where(valid, scores_ref[0].astype(jnp.float32),
                       jnp.float32(0.0))                            # (C, T)
    lab = labels_ref[0]                                             # (1, T) i32
    m = jnp.max(scores, axis=0, keepdims=True)                      # (1, T)
    lse = m + jnp.log(jnp.sum(jnp.exp(scores - m), axis=0, keepdims=True))
    cls_ids = jax.lax.broadcasted_iota(jnp.int32, (num_classes, tile_n), 0)
    tgt = jnp.sum(jnp.where(cls_ids == lab, scores, 0.0), axis=0, keepdims=True)
    ce = lse - tgt                                                  # (1, T)

    pos = jnp.logical_and(lab > 0, valid)
    ce = jnp.where(jnp.logical_or(pos, jnp.logical_not(valid)),
                   jnp.float32(0.0), ce)

    ce_ref[pl.ds(n, 1), :] = ce                                     # dense scratch
    pos_acc[...] += pos.astype(jnp.float32)                         # vector acc
    cemax_acc[...] = jnp.maximum(cemax_acc[...], ce)                # running max

    # ---- finalize this batch row: hard-negative mining via value bisection -----
    @pl.when(n == n_tiles - 1)
    def _finalize():
        num_pos = jnp.sum(pos_acc[...])
        k = jnp.minimum(jnp.float32(ratio) * num_pos, jnp.float32(n_orig - 1))

        ce_all = ce_ref[...]                                        # (n_tiles, T)
        lo0 = jnp.float32(0.0)                                      # count(>=lo) >= k
        hi0 = jnp.max(cemax_acc[...]) + jnp.float32(1.0)            # count(>=hi) <  k

        def body(_, carry):
            lo, hi = carry
            mid = (lo + hi) * 0.5
            cnt = jnp.sum((ce_all >= mid).astype(jnp.float32))
            ge = cnt >= k
            return jnp.where(ge, mid, lo), jnp.where(ge, hi, mid)

        lo, hi = jax.lax.fori_loop(0, bisect_iters, body, (lo0, hi0))

        # top-k sum: everything >= hi is strictly in the top-k; the remaining
        # (k - count) slots sit at the k-th value ~= lo (CE >= 0, so padding /
        # positive zeros never displace real values).
        above = ce_all >= hi
        c_hi = jnp.sum(above.astype(jnp.float32))
        s_hi = jnp.sum(jnp.where(above, ce_all, 0.0))
        conf = s_hi + (k - c_hi) * lo

        inv_n_loc = 1.0 / float(batch * n_orig * num_coords)
        loss_b = loc_w * (jnp.sum(sl1_acc[...]) * inv_n_loc) + conf_w * conf
        out_ref[...] = jnp.full(out_ref.shape, loss_b, dtype=jnp.float32)


def ssd_loss(predicted_locs, predicted_scores, boxes, labels,
             localization_weight=1.0, confidence_weight=1.0, neg_pos_ratio=3,
             tile_n=1024, scores_class_major=False):
    """Pallas TPU SSD MultiBox loss. Returns a scalar float32.

    predicted_scores may be given in the module layout (B, N, C) or, to avoid
    the single wrapper transpose entirely, class-major (B, C, N) with
    scores_class_major=True.  bf16 inputs are streamed as-is (halved HBM
    traffic); the kernel upcasts to f32 per tile.
    """
    B, N, L = predicted_locs.shape
    if scores_class_major:
        scores_cm = predicted_scores                       # (B, C, N)
        C = scores_cm.shape[1]
    else:
        C = predicted_scores.shape[-1]
        scores_cm = jnp.transpose(predicted_scores, (0, 2, 1))

    TILE_N = _round_up(min(int(tile_n), _round_up(N, 128)), 128)
    n_tiles = pl.cdiv(N, TILE_N)

    # Metadata-only layout plumbing (no pads, no extra HBM passes).
    labels_r = labels.astype(jnp.int32).reshape(B, 1, N)
    locs_f = predicted_locs.reshape(B, 1, N * L)
    boxes_f = boxes.reshape(B, 1, N * L)

    kernel = functools.partial(
        _ssd_loss_kernel,
        n_orig=int(N), tile_n=int(TILE_N), n_tiles=int(n_tiles),
        num_classes=int(C), batch=int(B), num_coords=int(L),
        loc_w=float(localization_weight), conf_w=float(confidence_weight),
        ratio=int(neg_pos_ratio), bisect_iters=26)

    out = pl.pallas_call(
        kernel,
        out_shape=jax.ShapeDtypeStruct((B, 1, 128), jnp.float32),
        grid_spec=pltpu.PrefetchScalarGridSpec(
            num_scalar_prefetch=0,
            grid=(B, n_tiles),
            in_specs=[
                pl.BlockSpec((1, C, TILE_N), lambda b, n: (b, 0, n)),
                pl.BlockSpec((1, 1, TILE_N), lambda b, n: (b, 0, n)),
                pl.BlockSpec((1, 1, L * TILE_N), lambda b, n: (b, 0, n)),
                pl.BlockSpec((1, 1, L * TILE_N), lambda b, n: (b, 0, n)),
            ],
            out_specs=pl.BlockSpec((1, 1, 128), lambda b, n: (b, 0, 0)),
            scratch_shapes=[
                pltpu.VMEM((n_tiles, TILE_N), jnp.float32),   # dense CE per prior
                pltpu.VMEM((1, TILE_N), jnp.float32),         # positives acc
                pltpu.VMEM((1, TILE_N), jnp.float32),         # running CE max
                pltpu.VMEM((1, L * TILE_N), jnp.float32),     # smooth-L1 acc
            ],
        ),
        compiler_params=pltpu.CompilerParams(
            dimension_semantics=("parallel", "arbitrary"),
            vmem_limit_bytes=32 * 1024 * 1024,
        ),
    )(scores_cm, labels_r, locs_f, boxes_f)

    return jnp.sum(out[:, 0, 0])


def ssd_loss_ref(locs, scores, boxes, labels, loc_w=1.0, conf_w=1.0, ratio=3):
    """Plain-JAX reference mirroring the PyTorch forward."""
    diff = locs - boxes
    ad = jnp.abs(diff)
    sl1 = jnp.where(ad < 1.0, 0.5 * diff * diff, ad - 0.5)
    loc_loss = jnp.mean(sl1)

    logz = jax.scipy.special.logsumexp(scores, axis=-1)
    tgt = jnp.take_along_axis(scores, labels[..., None], axis=-1)[..., 0]
    ce = logz - tgt
    pos = labels > 0
    ce = jnp.where(pos, 0.0, ce)
    num_pos = jnp.sum(pos.astype(jnp.int32), axis=1)
    num_neg = jnp.minimum(ratio * num_pos, labels.shape[1] - 1)
    ce_sorted = -jnp.sort(-ce, axis=1)                            # descending
    ranks = jnp.arange(labels.shape[1])[None, :]
    hard = ranks < num_neg[:, None]
    conf_loss = jnp.sum(jnp.where(hard, ce_sorted, 0.0))
    return loc_w * loc_loss + conf_w * conf_loss


if __name__ == "__main__":
    key = jax.random.PRNGKey(0)
    k1, k2, k3, k4 = jax.random.split(key, 4)

    B, N, C = 2, 500, 8   # batch, priors per image (exercises ragged tail), classes
    predicted_locs = jax.random.normal(k1, (B, N, 4), dtype=jnp.float32)
    predicted_scores = jax.random.normal(k2, (B, N, C), dtype=jnp.float32)
    boxes = jax.random.normal(k3, (B, N, 4), dtype=jnp.float32)
    labels = jax.random.randint(k4, (B, N), 0, C, dtype=jnp.int32)

    ref = ssd_loss_ref(predicted_locs, predicted_scores, boxes, labels)

    # 1) module layout (B, N, C)
    loss = jax.block_until_ready(
        ssd_loss(predicted_locs, predicted_scores, boxes, labels))
    assert jnp.allclose(loss, ref, rtol=1e-4, atol=1e-4), (float(loss), float(ref))

    # 2) class-major fast path (no wrapper transpose at all)
    scores_cm = jnp.transpose(predicted_scores, (0, 2, 1))
    loss_cm = jax.block_until_ready(
        ssd_loss(predicted_locs, scores_cm, boxes, labels, scores_class_major=True))
    assert jnp.allclose(loss_cm, ref, rtol=1e-4, atol=1e-4), (float(loss_cm), float(ref))

    # 3) all-background row (num_pos == 0) edge case
    labels0 = jnp.zeros_like(labels)
    ref0 = ssd_loss_ref(predicted_locs, predicted_scores, boxes, labels0)
    loss0 = jax.block_until_ready(
        ssd_loss(predicted_locs, predicted_scores, boxes, labels0))
    assert jnp.allclose(loss0, ref0, rtol=1e-4, atol=1e-4), (float(loss0), float(ref0))

    # 4) bf16-streamed activations (halved HBM traffic; kernel math stays f32)
    loss_bf16 = jax.block_until_ready(ssd_loss(
        predicted_locs.astype(jnp.bfloat16), predicted_scores.astype(jnp.bfloat16),
        boxes.astype(jnp.bfloat16), labels))
    assert jnp.allclose(loss_bf16, ref, rtol=5e-2, atol=5e-2), (float(loss_bf16), float(ref))

    print("KERNEL_OK")
</pallas_src>

<mosaic_0001>
module attributes {stable_mosaic.version = 11 : i64} {
  func.func @_ssd_loss_kernel(%arg0: i32, %arg1: i32, %arg2: memref<1x8x512xf32, #tpu.memory_space<vmem>>, %arg3: memref<1x1x512xi32, #tpu.memory_space<vmem>>, %arg4: memref<1x1x2048xf32, #tpu.memory_space<vmem>>, %arg5: memref<1x1x2048xf32, #tpu.memory_space<vmem>>, %arg6: memref<1x1x128xf32, #tpu.memory_space<vmem>>, %arg7: memref<1x512xf32, #tpu.memory_space<vmem>>, %arg8: memref<1x512xf32, #tpu.memory_space<vmem>>, %arg9: memref<1x512xf32, #tpu.memory_space<vmem>>, %arg10: memref<1x2048xf32, #tpu.memory_space<vmem>>) attributes {dimension_semantics = [#tpu.dimension_semantics<parallel>, #tpu.dimension_semantics<arbitrary>], iteration_bounds = array<i64: 2, 1>, scalar_prefetch = 0 : i64, scratch_operands = 4 : i64, tpu.core_type = #tpu.core_type<tc>, window_params = [{transform_indices = @transform_0, window_bounds = array<i64: 1, 8, 512>}, {transform_indices = @transform_1, window_bounds = array<i64: 1, 1, 512>}, {transform_indices = @transform_2, window_bounds = array<i64: 1, 1, 2048>}, {transform_indices = @transform_3, window_bounds = array<i64: 1, 1, 2048>}, {transform_indices = @transform_4, window_bounds = array<i64: 1, 1, 128>}]} {
    %c0_i32 = arith.constant 0 : i32
    %0 = arith.cmpi eq, %arg1, %c0_i32 : i32
    %1 = arith.extui %0 : i1 to i32
    %c0_i32_0 = arith.constant 0 : i32
    %2 = arith.cmpi ne, %1, %c0_i32_0 : i32
    scf.if %2 {
      %cst_38 = arith.constant 0.000000e+00 : f32
      %79 = vector.broadcast %cst_38 : f32 to vector<1x512xf32>
      %c0_39 = arith.constant 0 : index
      %c0_40 = arith.constant 0 : index
      %80 = vector.load %arg8[%c0_39, %c0_40] : memref<1x512xf32, #tpu.memory_space<vmem>>, vector<1x512xf32>
      tpu.vector_store %arg8[%c0_39, %c0_40], %79 {strides = array<i32>} : memref<1x512xf32, #tpu.memory_space<vmem>>, vector<1x512xf32>,
      %cst_41 = arith.constant 0.000000e+00 : f32
      %81 = vector.broadcast %cst_41 : f32 to vector<1x512xf32>
      %c0_42 = arith.constant 0 : index
      %c0_43 = arith.constant 0 : index
      %82 = vector.load %arg9[%c0_42, %c0_43] : memref<1x512xf32, #tpu.memory_space<vmem>>, vector<1x512xf32>
      tpu.vector_store %arg9[%c0_42, %c0_43], %81 {strides = array<i32>} : memref<1x512xf32, #tpu.memory_space<vmem>>, vector<1x512xf32>,
      %cst_44 = arith.constant 0.000000e+00 : f32
      %83 = vector.broadcast %cst_44 : f32 to vector<1x2048xf32>
      %c0_45 = arith.constant 0 : index
      %c0_46 = arith.constant 0 : index
      %84 = vector.load %arg10[%c0_45, %c0_46] : memref<1x2048xf32, #tpu.memory_space<vmem>>, vector<1x2048xf32>
      tpu.vector_store %arg10[%c0_45, %c0_46], %83 {strides = array<i32>} : memref<1x2048xf32, #tpu.memory_space<vmem>>, vector<1x2048xf32>,
    } else {
    }
    %c0 = arith.constant 0 : index
    %c0_1 = arith.constant 0 : index
    %c0_2 = arith.constant 0 : index
    %3 = vector.load %arg4[%c0, %c0_1, %c0_2] : memref<1x1x2048xf32, #tpu.memory_space<vmem>>, vector<1x1x2048xf32>
    %4 = vector.shape_cast %3 : vector<1x1x2048xf32> to vector<1x2048xf32>
    %c0_3 = arith.constant 0 : index
    %c0_4 = arith.constant 0 : index
    %c0_5 = arith.constant 0 : index
    %5 = vector.load %arg5[%c0_3, %c0_4, %c0_5] : memref<1x1x2048xf32, #tpu.memory_space<vmem>>, vector<1x1x2048xf32>
    %6 = vector.shape_cast %5 : vector<1x1x2048xf32> to vector<1x2048xf32>
    %7 = arith.subf %4, %6 : vector<1x2048xf32>
    %8 = math.absf %7 : vector<1x2048xf32>
    %cst = arith.constant 1.000000e+00 : f32
    %9 = vector.broadcast %cst : f32 to vector<1x2048xf32>
    %10 = arith.cmpf olt, %8, %9 : vector<1x2048xf32>
    %cst_6 = arith.constant 5.000000e-01 : f32
    %11 = vector.broadcast %cst_6 : f32 to vector<1x2048xf32>
    %12 = arith.mulf %11, %7 : vector<1x2048xf32>
    %13 = arith.mulf %12, %7 : vector<1x2048xf32>
    %cst_7 = arith.constant 5.000000e-01 : f32
    %14 = vector.broadcast %cst_7 : f32 to vector<1x2048xf32>
    %15 = arith.subf %8, %14 : vector<1x2048xf32>
    %16 = arith.select %10, %13, %15 : vector<1x2048xi1>, vector<1x2048xf32>
    %c2048_i32 = arith.constant 2048 : i32
    %17 = arith.muli %arg1, %c2048_i32 : i32
    %18 = tpu.iota {dimensions = array<i32: 1>} : vector<1x2048xi32>
    %19 = vector.broadcast %17 : i32 to vector<1x2048xi32>
    %20 = arith.addi %19, %18 : vector<1x2048xi32>
    %c2000_i32 = arith.constant 2000 : i32
    %21 = vector.broadcast %c2000_i32 : i32 to vector<1x2048xi32>
    %22 = arith.cmpi slt, %20, %21 : vector<1x2048xi32>
    %cst_8 = arith.constant 0.000000e+00 : f32
    %23 = vector.broadcast %cst_8 : f32 to vector<1x2048xf32>
    %24 = arith.select %22, %16, %23 : vector<1x2048xi1>, vector<1x2048xf32>
    %c0_9 = arith.constant 0 : index
    %c0_10 = arith.constant 0 : index
    %25 = vector.load %arg10[%c0_9, %c0_10] : memref<1x2048xf32, #tpu.memory_space<vmem>>, vector<1x2048xf32>
    %26 = arith.addf %25, %24 : vector<1x2048xf32>
    %c0_11 = arith.constant 0 : index
    %c0_12 = arith.constant 0 : index
    %27 = vector.load %arg10[%c0_11, %c0_12] : memref<1x2048xf32, #tpu.memory_space<vmem>>, vector<1x2048xf32>
    tpu.vector_store %arg10[%c0_11, %c0_12], %26 {strides = array<i32>} : memref<1x2048xf32, #tpu.memory_space<vmem>>, vector<1x2048xf32>,
    %c512_i32 = arith.constant 512 : i32
    %28 = arith.muli %arg1, %c512_i32 : i32
    %29 = tpu.iota {dimensions = array<i32: 1>} : vector<1x512xi32>
    %30 = vector.broadcast %28 : i32 to vector<1x512xi32>
    %31 = arith.addi %30, %29 : vector<1x512xi32>
    %c500_i32 = arith.constant 500 : i32
    %32 = vector.broadcast %c500_i32 : i32 to vector<1x512xi32>
    %33 = arith.cmpi slt, %31, %32 : vector<1x512xi32>
    %c0_13 = arith.constant 0 : index
    %c0_14 = arith.constant 0 : index
    %c0_15 = arith.constant 0 : index
    %34 = vector.load %arg2[%c0_13, %c0_14, %c0_15] : memref<1x8x512xf32, #tpu.memory_space<vmem>>, vector<1x8x512xf32>
    %35 = vector.shape_cast %34 : vector<1x8x512xf32> to vector<8x512xf32>
    %cst_16 = arith.constant 0.000000e+00 : f32
    %36 = vector.shape_cast %33 : vector<1x512xi1> to vector<1x512xi1>
    %37 = vector.broadcast %36 : vector<1x512xi1> to vector<8x512xi1>
    %38 = vector.broadcast %cst_16 : f32 to vector<8x512xf32>
    %39 = arith.select %37, %35, %38 : vector<8x512xi1>, vector<8x512xf32>
    %c0_17 = arith.constant 0 : index
    %c0_18 = arith.constant 0 : index
    %c0_19 = arith.constant 0 : index
    %40 = vector.load %arg3[%c0_17, %c0_18, %c0_19] : memref<1x1x512xi32, #tpu.memory_space<vmem>>, vector<1x1x512xi32>
    %41 = vector.shape_cast %40 : vector<1x1x512xi32> to vector<1x512xi32>
    %cst_20 = arith.constant dense<0xFF800000> : vector<512xf32>
    %42 = vector.multi_reduction <maximumf>, %39, %cst_20 [0] : vector<8x512xf32> to vector<512xf32>
    %43 = vector.shape_cast %42 : vector<512xf32> to vector<1x512xf32>
    %44 = vector.broadcast %43 : vector<1x512xf32> to vector<8x512xf32>
    %45 = arith.subf %39, %44 : vector<8x512xf32>
    %46 = math.exp %45 : vector<8x512xf32>
    %cst_21 = arith.constant dense<0.000000e+00> : vector<512xf32>
    %47 = vector.multi_reduction <add>, %46, %cst_21 [0] : vector<8x512xf32> to vector<512xf32>
    %48 = vector.shape_cast %47 : vector<512xf32> to vector<1x512xf32>
    %49 = math.log %48 : vector<1x512xf32>
    %50 = arith.addf %43, %49 : vector<1x512xf32>
    %51 = tpu.iota {dimensions = array<i32: 0>} : vector<8x512xi32>
    %52 = vector.broadcast %41 : vector<1x512xi32> to vector<8x512xi32>
    %53 = arith.cmpi eq, %51, %52 : vector<8x512xi32>
    %cst_22 = arith.constant 0.000000e+00 : f32
    %54 = vector.broadcast %cst_22 : f32 to vector<8x512xf32>
    %55 = arith.select %53, %39, %54 : vector<8x512xi1>, vector<8x512xf32>
    %cst_23 = arith.constant dense<0.000000e+00> : vector<512xf32>
    %56 = vector.multi_reduction <add>, %55, %cst_23 [0] : vector<8x512xf32> to vector<512xf32>
    %57 = vector.shape_cast %56 : vector<512xf32> to vector<1x512xf32>
    %58 = arith.subf %50, %57 : vector<1x512xf32>
    %c0_i32_24 = arith.constant 0 : i32
    %59 = vector.broadcast %c0_i32_24 : i32 to vector<1x512xi32>
    %60 = arith.cmpi sgt, %41, %59 : vector<1x512xi32>
    %61 = arith.andi %60, %33 : vector<1x512xi1>
    %cst_25 = arith.constant dense<true> : vector<1x512xi1>
    %62 = arith.xori %33, %cst_25 : vector<1x512xi1>
    %63 = arith.ori %61, %62 : vector<1x512xi1>
    %cst_26 = arith.constant 0.000000e+00 : f32
    %64 = vector.broadcast %cst_26 : f32 to vector<1x512xf32>
    %65 = arith.select %63, %64, %58 : vector<1x512xi1>, vector<1x512xf32>
    %66 = arith.index_cast %arg1 : i32 to index
    %c0_27 = arith.constant 0 : index
    %67 = vector.load %arg7[%66, %c0_27] : memref<1x512xf32, #tpu.memory_space<vmem>>, vector<1x512xf32>
    tpu.vector_store %arg7[%66, %c0_27], %65 {strides = array<i32>} : memref<1x512xf32, #tpu.memory_space<vmem>>, vector<1x512xf32>,
    %c0_28 = arith.constant 0 : index
    %c0_29 = arith.constant 0 : index
    %68 = vector.load %arg8[%c0_28, %c0_29] : memref<1x512xf32, #tpu.memory_space<vmem>>, vector<1x512xf32>
    %69 = arith.extui %61 : vector<1x512xi1> to vector<1x512xi32>
    %70 = arith.sitofp %69 : vector<1x512xi32> to vector<1x512xf32>
    %71 = arith.addf %68, %70 : vector<1x512xf32>
    %c0_30 = arith.constant 0 : index
    %c0_31 = arith.constant 0 : index
    %72 = vector.load %arg8[%c0_30, %c0_31] : memref<1x512xf32, #tpu.memory_space<vmem>>, vector<1x512xf32>
    tpu.vector_store %arg8[%c0_30, %c0_31], %71 {strides = array<i32>} : memref<1x512xf32, #tpu.memory_space<vmem>>, vector<1x512xf32>,
    %c0_32 = arith.constant 0 : index
    %c0_33 = arith.constant 0 : index
    %73 = vector.load %arg9[%c0_32, %c0_33] : memref<1x512xf32, #tpu.memory_space<vmem>>, vector<1x512xf32>
    %74 = arith.maximumf %73, %65 : vector<1x512xf32>
    %c0_34 = arith.constant 0 : index
    %c0_35 = arith.constant 0 : index
    %75 = vector.load %arg9[%c0_34, %c0_35] : memref<1x512xf32, #tpu.memory_space<vmem>>, vector<1x512xf32>
    tpu.vector_store %arg9[%c0_34, %c0_35], %74 {strides = array<i32>} : memref<1x512xf32, #tpu.memory_space<vmem>>, vector<1x512xf32>,
    %c0_i32_36 = arith.constant 0 : i32
    %76 = arith.cmpi eq, %arg1, %c0_i32_36 : i32
    %77 = arith.extui %76 : i1 to i32
    %c0_i32_37 = arith.constant 0 : i32
    %78 = arith.cmpi ne, %77, %c0_i32_37 : i32
    scf.if %78 {
      %c0_38 = arith.constant 0 : index
      %c0_39 = arith.constant 0 : index
      %79 = vector.load %arg8[%c0_38, %c0_39] : memref<1x512xf32, #tpu.memory_space<vmem>>, vector<1x512xf32>
      %80 = vector.shape_cast %79 : vector<1x512xf32> to vector<1x1x512xf32>
      %cst_40 = arith.constant dense<0.000000e+00> : vector<1xf32>
      %81 = vector.multi_reduction <add>, %80, %cst_40 [1, 2] : vector<1x1x512xf32> to vector<1xf32>
      %82 = vector.shape_cast %81 : vector<1xf32> to vector<1x1x1xf32>
      %83 = vector.extract %82[0, 0, 0] : f32 from vector<1x1x1xf32>
      %cst_41 = arith.constant 3.000000e+00 : f32
      %84 = arith.mulf %cst_41, %83 : f32
      %cst_42 = arith.constant 4.990000e+02 : f32
      %85 = arith.minimumf %84, %cst_42 : f32
      %c0_43 = arith.constant 0 : index
      %c0_44 = arith.constant 0 : index
      %86 = vector.load %arg7[%c0_43, %c0_44] : memref<1x512xf32, #tpu.memory_space<vmem>>, vector<1x512xf32>
      %c0_45 = arith.constant 0 : index
      %c0_46 = arith.constant 0 : index
      %87 = vector.load %arg9[%c0_45, %c0_46] : memref<1x512xf32, #tpu.memory_space<vmem>>, vector<1x512xf32>
      %88 = vector.shape_cast %87 : vector<1x512xf32> to vector<1x1x512xf32>
      %cst_47 = arith.constant dense<0xFF800000> : vector<1xf32>
      %89 = vector.multi_reduction <maximumf>, %88, %cst_47 [1, 2] : vector<1x1x512xf32> to vector<1xf32>
      %90 = vector.shape_cast %89 : vector<1xf32> to vector<1x1x1xf32>
      %91 = vector.extract %90[0, 0, 0] : f32 from vector<1x1x1xf32>
      %cst_48 = arith.constant 1.000000e+00 : f32
      %92 = arith.addf %91, %cst_48 : f32
      %cst_49 = arith.constant 0.000000e+00 : f32
      %c0_i32_50 = arith.constant 0 : i32
      %c26_i32 = arith.constant 26 : i32
      %93 = arith.addi %c0_i32_50, %c26_i32 : i32
      %c1_i32 = arith.constant 1 : i32
      %94:2 = scf.for %arg11 = %c0_i32_50 to %93 step %c1_i32 iter_args(%arg12 = %cst_49, %arg13 = %92) -> (f32, f32)  : i32 {
        %123 = arith.addf %arg12, %arg13 : f32
        %cst_63 = arith.constant 5.000000e-01 : f32
        %124 = arith.mulf %123, %cst_63 : f32
        %125 = vector.broadcast %124 : f32 to vector<1x512xf32>
        %126 = arith.cmpf oge, %86, %125 : vector<1x512xf32>
        %127 = arith.extui %126 : vector<1x512xi1> to vector<1x512xi32>
        %128 = arith.sitofp %127 : vector<1x512xi32> to vector<1x512xf32>
        %129 = vector.shape_cast %128 : vector<1x512xf32> to vector<1x1x512xf32>
        %cst_64 = arith.constant dense<0.000000e+00> : vector<1xf32>
        %130 = vector.multi_reduction <add>, %129, %cst_64 [1, 2] : vector<1x1x512xf32> to vector<1xf32>
        %131 = vector.shape_cast %130 : vector<1xf32> to vector<1x1x1xf32>
        %132 = vector.extract %131[0, 0, 0] : f32 from vector<1x1x1xf32>
        %133 = arith.cmpf oge, %132, %85 : f32
        %134 = arith.select %133, %124, %arg12 : f32
        %135 = arith.select %133, %arg13, %124 : f32
        scf.yield %134, %135 : f32, f32
      }
      %95 = vector.broadcast %94#1 : f32 to vector<1x512xf32>
      %96 = arith.cmpf oge, %86, %95 : vector<1x512xf32>
      %97 = arith.extui %96 : vector<1x512xi1> to vector<1x512xi32>
      %98 = arith.sitofp %97 : vector<1x512xi32> to vector<1x512xf32>
      %99 = vector.shape_cast %98 : vector<1x512xf32> to vector<1x1x512xf32>
      %cst_51 = arith.constant dense<0.000000e+00> : vector<1xf32>
      %100 = vector.multi_reduction <add>, %99, %cst_51 [1, 2] : vector<1x1x512xf32> to vector<1xf32>
      %101 = vector.shape_cast %100 : vector<1xf32> to vector<1x1x1xf32>
      %102 = vector.extract %101[0, 0, 0] : f32 from vector<1x1x1xf32>
      %cst_52 = arith.constant 0.000000e+00 : f32
      %103 = vector.broadcast %cst_52 : f32 to vector<1x512xf32>
      %104 = arith.select %96, %86, %103 : vector<1x512xi1>, vector<1x512xf32>
      %105 = vector.shape_cast %104 : vector<1x512xf32> to vector<1x1x512xf32>
      %cst_53 = arith.constant dense<0.000000e+00> : vector<1xf32>
      %106 = vector.multi_reduction <add>, %105, %cst_53 [1, 2] : vector<1x1x512xf32> to vector<1xf32>
      %107 = vector.shape_cast %106 : vector<1xf32> to vector<1x1x1xf32>
      %108 = vector.extract %107[0, 0, 0] : f32 from vector<1x1x1xf32>
      %109 = arith.subf %85, %102 : f32
      %110 = arith.mulf %109, %94#0 : f32
      %111 = arith.addf %108, %110 : f32
      %c0_54 = arith.constant 0 : index
      %c0_55 = arith.constant 0 : index
      %112 = vector.load %arg10[%c0_54, %c0_55] : memref<1x2048xf32, #tpu.memory_space<vmem>>, vector<1x2048xf32>
      %113 = vector.shape_cast %112 : vector<1x2048xf32> to vector<1x1x2048xf32>
      %cst_56 = arith.constant dense<0.000000e+00> : vector<1xf32>
      %114 = vector.multi_reduction <add>, %113, %cst_56 [1, 2] : vector<1x1x2048xf32> to vector<1xf32>
      %115 = vector.shape_cast %114 : vector<1xf32> to vector<1x1x1xf32>
      %116 = vector.extract %115[0, 0, 0] : f32 from vector<1x1x1xf32>
      %cst_57 = arith.constant 2.500000e-04 : f32
      %117 = arith.mulf %116, %cst_57 : f32
      %cst_58 = arith.constant 1.000000e+00 : f32
      %118 = arith.mulf %cst_58, %117 : f32
      %cst_59 = arith.constant 1.000000e+00 : f32
      %119 = arith.mulf %cst_59, %111 : f32
      %120 = arith.addf %118, %119 : f32
      %121 = vector.broadcast %120 : f32 to vector<1x1x128xf32>
      %c0_60 = arith.constant 0 : index
      %c0_61 = arith.constant 0 : index
      %c0_62 = arith.constant 0 : index
      %122 = vector.load %arg6[%c0_60, %c0_61, %c0_62] : memref<1x1x128xf32, #tpu.memory_space<vmem>>, vector<1x1x128xf32>
      tpu.vector_store %arg6[%c0_60, %c0_61, %c0_62], %121 {strides = array<i32>} : memref<1x1x128xf32, #tpu.memory_space<vmem>>, vector<1x1x128xf32>,
    } else {
    }
    return
  }
  func.func @transform_0(%arg0: i32, %arg1: i32) -> (i32, i32, i32) {
    %c0_i32 = arith.constant 0 : i32
    %c0_i32_0 = arith.constant 0 : i32
    return %arg0, %c0_i32, %arg1 : i32, i32, i32
  }
  func.func @transform_1(%arg0: i32, %arg1: i32) -> (i32, i32, i32) {
    %c0_i32 = arith.constant 0 : i32
    %c0_i32_0 = arith.constant 0 : i32
    return %arg0, %c0_i32, %arg1 : i32, i32, i32
  }
  func.func @transform_2(%arg0: i32, %arg1: i32) -> (i32, i32, i32) {
    %c0_i32 = arith.constant 0 : i32
    %c0_i32_0 = arith.constant 0 : i32
    return %arg0, %c0_i32, %arg1 : i32, i32, i32
  }
  func.func @transform_3(%arg0: i32, %arg1: i32) -> (i32, i32, i32) {
    %c0_i32 = arith.constant 0 : i32
    %c0_i32_0 = arith.constant 0 : i32
    return %arg0, %c0_i32, %arg1 : i32, i32, i32
  }
  func.func @transform_4(%arg0: i32, %arg1: i32) -> (i32, i32, i32) {
    %c0_i32 = arith.constant 0 : i32
    %c0_i32_0 = arith.constant 0 : i32
    %c0_i32_1 = arith.constant 0 : i32
    return %arg0, %c0_i32, %c0_i32_0 : i32, i32, i32
  }
}

</mosaic_0001>

<bundles_post_ra>
// kernel: tpu_custom_call.1
= control target key start
LH: loop header
LB: loop body
LE: loop exit
PB: predicated region body
PF: predicated region fallthrough
CT: control target
= control target key end

     0   :  { %s2365_s0 = inlined_call_operand.hbm [shape: f32[2,8,500], index: 0, kind: input, shape index: {}]   ;;  %s2366_s1 = inlined_call_operand.hbm [shape: s32[2,1,500], index: 1, kind: input, shape index: {}]   ;;  %s2367_s2 = inlined_call_operand.hbm [shape: f32[2,1,2000], index: 2, kind: input, shape index: {}]   ;;  %s2368_s3 = inlined_call_operand.hbm [shape: f32[2,1,2000], index: 3, kind: input, shape index: {}]   ;;  %s2369_s4 = inlined_call_operand.hbm [shape: f32[2,1,128], index: 4, kind: output, shape index: {}]  }
   0x1   :  { %2371 = sst [smem:[#allocation21_spill]] %s2365_s0 }
   0x2   :  { %2372 = sst [smem:[#allocation22_spill]] %s2366_s1 }
   0x3   :  { %9 = vsyncpa [#allocation7], 0 }
   0x4   :  { %11 = vsyncpa [#allocation7 + $0x1], 0 }
   0x5   :  { %12 = vsyncpa [#allocation10], 0 }
   0x6   :  { %14 = vsyncpa [#allocation10 + $0x1], 0 }
   0x7   :  { %15 = vsyncpa [#allocation13], 0 }
   0x8   :  { %17 = vsyncpa [#allocation13 + $0x1], 0 }
   0x9   :  { %18 = vsyncpa [#allocation8], 0 }
   0xa   :  { %20 = vsyncpa [#allocation8 + $0x1], 0  ;;  %s1874_s15 = smov 0   ;;  %s1876_s16 = smov 0  }
   0xb   :  { %s1878_s17 = smov 0   ;;  %s1880_s18 = smov 0  }
   0xc   :  { %s1882_s19 = smov 0   ;;  %s1884_s20 = smov 0  }
   0xd LB: > { %s1905_s21 = sadd.s32 4294967295, %s1823_s20   ;;  %s1443_s22 = sadd.s32 4294967294, %s1823_s20   ;;  %s1823_s20 = sphi %s1884_s20, %s26_s20   ;;  %s1819_s19 = sphi %s1882_s19, %s2396_s19   ;;  %s1815_s18 = sphi %s1880_s18, %s2395_s18   ;;  %s1811_s17 = sphi %s1878_s17, %s2394_s17   ;;  %s1807_s16 = sphi %s1876_s16, %s2393_s16   ;;  %s1803_s15 = sphi %s1874_s15, %s2392_s15  }
   0xe   : > { %s38_s23 = sadd.s32 1, %s1819_s19  ;;  %s47_s24 = sadd.s32 1, %s1811_s17 }
   0xf   : > { %p40_p0 = scmp.ge.s32.totalorder %s38_s23, 2  ;;  %p54_p1 = scmp.ne.s32.totalorder %s1811_s17, %s1807_s16 }
  0x10   : > { %p55_p2 = scmp.eq.s32.totalorder %s1823_s20, 0  ;;  %p60_p3 = scmp.ne.s32.totalorder %s1807_s16, %s1803_s15 }
  0x11   : > { %s2398_s23 = smov (%p40_p0, %s38_s23), 0  ;;  %p61_p5 = scmp.eq.s32.totalorder %s1905_s21, 0 }
  0x12   : > { %2373 = sst [smem:[#allocation19_spill]] %s2398_s23  ;;  %p1917_p4 = por %p55_p2, %p54_p1 }
  0x13   : > { %s42_s26 = ssub.s32 %s1819_s19, %s2398_s23  ;;  %p168_p6 = scmp.eq.s32.totalorder %s1905_s21, 1 }
  0x14   : > { %p45_p7 = scmp.eq.s32.totalorder %s42_s26, 0  ;;  %p1925_p8 = por %p61_p5, %p60_p3 }
  0x15   : > { %p1929_p9 = por %p168_p6, %p54_p1  ;;  %p174_p10 = scmp.eq.s32.totalorder %s1443_s22, 1 }
  0x16   : > { %s1934_s29 = scalar_select %p45_p7, %s1811_s17, %s47_s24  }
  0x17   : > { %p1936_p11 = por %p174_p10, %p60_p3  ;;  %p1514_p13 = scmp.lt.s32.totalorder %s1823_s20, 2 }
  0x18   : > { %2377 = sst [smem:[#allocation20_spill]] %s1934_s29  ;;  %s1943_s5 = sand.u32 1, %s1811_s17  }
  0x19   : > { %s215_s6 = sand.u32 1, %s1823_s20   ;;  %s1449_s7 = sshll.u32 %s1943_s5, 2 }
  0x1a   : > { %p1949_p0 = pnand %p1514_p13, %p1917_p4  ;;  %s1472_s9 = sshll.u32 %s1819_s19, 6 }
  0x1b   : > { %s2380_s1 = sld [smem:[#allocation22_spill]]  ;;  %s219_s13 = scalar_lea.vmem [#allocation9], %s1449_s7 }
  0x1c   : > { %s229_s14 = sshll.u32 %s219_s13, 4  ;;  %p1458_p1 = scmp.ge.s32.totalorder %s1823_s20, 1  ;;  %s230_s14 = int_to_ptr.vmem [resolvable:$true] %s229_s14 }
  0x1d   : > { %p276_p2 = scmp.lt.s32.totalorder %s1823_s20, 3  ;;  %s1959_s22 = scalar_lea.sflag [#allocation10], %s215_s6 }
  0x1e   : > { %p1613_p3 = pneg %p1949_p0  ;;  %s1624_s24 = scalar_lea.vmem %s230_s14, 64 }
  0x1f   : > { %p1625_p4 = scmp.ne.s32.totalorder %s230_s14, %s1624_s24  ;;  %s1837_s25 = smov [#allocation9]  }
  0x20   : > { %s1629_s26 = sshll.u32 %s1837_s25, 4  ;;  %s1630_s26 = int_to_ptr.vmem [resolvable:$false] %s1629_s26 }
  0x21   : > { %s227_s12 = scalar_lea.hbm %s2380_s1, %s1472_s9  ;;  %p1627_p5 = pnand %p1625_p4, %p1613_p3 }
  0x22   : > { %s1631_s10 = scalar_lea.vmem %s1630_s26, 128  ;;  %p1632_p7 = scmp.lt.s32.totalorder %s230_s14, %s1630_s26 }
  0x23   : > { %p1628_p6 = pneg %p1627_p5  ;;  %p1633_p10 = scmp.lt.s32.totalorder %s1631_s10, %s1624_s24 }
  0x25   : > { %p1634_p13 = por %p1633_p10, %p1632_p7 }
  0x27   : > { %p1635_p12 = pnand %p1634_p13, %p1628_p6 }
  0x29   : > { %1638 = shalt.err (!%p1635_p12)
}
  0x2a   : > { %1503 = dma.hbm_to_vmem [thread:$0]  (!%p1949_p0), %s227_s12, 64, %s230_s14, %s1959_s22  }
  0x2b   : > { %p1973_p4 = pnand %p1458_p1, %p276_p2  ;;  %s1446_s7 = sshll.u32 %s1943_s5, 5 }
  0x2c   : > { %s1471_s9 = sshll.u32 %s1819_s19, 9  ;;  %s2382_s0 = sld [smem:[#allocation21_spill]] }
  0x2d   : > { %s198_s25 = scalar_lea.vmem [#allocation6], %s1446_s7  ;;  %s1452_s10 = sshll.u32 %s1943_s5, 4 }
  0x2e   : > { %s208_s26 = sshll.u32 %s198_s25, 4  ;;  %s195_s1 = scalar_lea.sflag [#allocation7], %s1943_s5  ;;  %s209_s26 = int_to_ptr.vmem [resolvable:$true] %s208_s26 }
  0x2f   : > { %s1652_s23 = scalar_lea.vmem %s209_s26, 512  ;;  %s1838_s12 = smov [#allocation6]  }
  0x30   : > { %p1653_p12 = scmp.ne.s32.totalorder %s209_s26, %s1652_s23  ;;  %s1657_s14 = sshll.u32 %s1838_s12, 4  ;;  %s1658_s14 = int_to_ptr.vmem [resolvable:$false] %s1657_s14 }
  0x31   : > { %s1659_s29 = scalar_lea.vmem %s1658_s14, 1024  ;;  %p1660_p2 = scmp.lt.s32.totalorder %s209_s26, %s1658_s14 }
  0x32   : > { %s206_s24 = scalar_lea.hbm %s2382_s0, %s1471_s9  ;;  %p1655_p5 = pnand %p1653_p12, %p1613_p3 }
  0x33   : > { %p1661_p6 = scmp.lt.s32.totalorder %s1659_s29, %s1652_s23 }
  0x34   : > { %p1656_p1 = pneg %p1655_p5 }
  0x35   : > { %p1662_p7 = por %p1661_p6, %p1660_p2 }
  0x37   : > { %p1663_p10 = pnand %p1662_p7, %p1656_p1 }
  0x39   : > { %1666 = shalt.err (!%p1663_p10)
}
  0x3a   : > { %1500 = dma.hbm_to_vmem [thread:$0]  (!%p1949_p0), %s206_s24, 512, %s209_s26, %s195_s1  }
  0x3b   : > { %s1473_s7 = sshll.u32 %s1819_s19, 8  ;;  %s240_s9 = scalar_lea.vmem [#allocation11], %s1452_s10 }
  0x3c   : > { %s250_s11 = sshll.u32 %s240_s9, 4  ;;  %s248_s12 = scalar_lea.hbm %s2367_s2, %s1473_s7  ;;  %s251_s11 = int_to_ptr.vmem [resolvable:$true] %s250_s11 }
  0x3d   : > { %s1680_s14 = scalar_lea.vmem %s251_s11, 256  ;;  %s1839_s23 = smov [#allocation11]  }
  0x3e   : > { %p1681_p13 = scmp.ne.s32.totalorder %s251_s11, %s1680_s14  ;;  %s1685_s29 = sshll.u32 %s1839_s23, 4  ;;  %s1686_s29 = int_to_ptr.vmem [resolvable:$false] %s1685_s29 }
  0x3f   : > { %s1687_s0 = scalar_lea.vmem %s1686_s29, 512  ;;  %p1688_p1 = scmp.lt.s32.totalorder %s251_s11, %s1686_s29 }
  0x40   : > { %p1683_p12 = pnand %p1681_p13, %p1613_p3  ;;  %p1689_p2 = scmp.lt.s32.totalorder %s1687_s0, %s1680_s14 }
  0x42   : > { %p1684_p5 = pneg %p1683_p12  ;;  %p1690_p6 = por %p1689_p2, %p1688_p1 }
  0x44   : > { %p1691_p7 = pnand %p1690_p6, %p1684_p5 }
  0x46   : > { %1694 = shalt.err (!%p1691_p7)
}
  0x47   : > { %1506 = dma.hbm_to_vmem [thread:$0]  (!%p1949_p0), %s248_s12, 256, %s251_s11, %s1959_s22  }
  0x48   : > { %s269_s26 = scalar_lea.hbm %s2368_s3, %s1473_s7  ;;  %s261_s9 = scalar_lea.vmem [#allocation12], %s1452_s10 }
  0x49   : > { %s271_s13 = sshll.u32 %s261_s9, 4  ;;  %s258_s25 = scalar_lea.sflag [#allocation13], %s1943_s5  ;;  %s272_s13 = int_to_ptr.vmem [resolvable:$true] %s271_s13 }
  0x4a   : > { %s1708_s0 = scalar_lea.vmem %s272_s13, 256  ;;  %s1840_s14 = smov [#allocation12]  }
  0x4b   : > { %p1709_p10 = scmp.ne.s32.totalorder %s272_s13, %s1708_s0  ;;  %s1713_s23 = sshll.u32 %s1840_s14, 4  ;;  %s1714_s23 = int_to_ptr.vmem [resolvable:$false] %s1713_s23 }
  0x4c   : > { %s1715_s29 = scalar_lea.vmem %s1714_s23, 512  ;;  %p1716_p5 = scmp.lt.s32.totalorder %s272_s13, %s1714_s23 }
  0x4d   : > { %p1711_p13 = pnand %p1709_p10, %p1613_p3  ;;  %p1717_p1 = scmp.lt.s32.totalorder %s1715_s29, %s1708_s0 }
  0x4f   : > { %p1712_p12 = pneg %p1711_p13  ;;  %p1718_p2 = por %p1717_p1, %p1716_p5 }
  0x51   : > { %p1719_p6 = pnand %p1718_p2, %p1712_p12 }
  0x53   : > { %1722 = shalt.err (!%p1719_p6)
}
  0x54   : > { %1509 = dma.hbm_to_vmem [thread:$0]  (!%p1949_p0), %s269_s26, 256, %s272_s13, %s258_s25  }
  0x55   : > { %280 = sbr.rel (%p1973_p4) target bundleno = 867 (0x363), region = 36  ;;  %s2015_s5 = sand.u32 (!%p1973_p4), 1, %s1807_s16  }
  0x56   : > { %s1459_s22 = sshll.u32 (!%p1973_p4), %s2015_s5, 5  ;;  %s283_s10 = scalar_lea.sflag (!%p1973_p4), [#allocation7], %s2015_s5 }
  0x57   : > { %s2019_s7 = scalar_lea.vmem (!%p1973_p4), [#allocation6], %s1459_s22 }
  0x5a   : > { %1786 = dma.done.wait (%p1925_p8), %s283_s10, 512  }
  0x5b   : > { %1788 = vsyncadd (%p1925_p8), %s283_s10, 4294966784  ;;  %s291_s8 = sand.u32 1, %s1905_s21   ;;  %s1460_s6 = sshll.u32 %s2015_s5, 2 }
  0x5c   : > { %s292_s11 = scalar_lea.sflag [#allocation10], %s291_s8  ;;  %s2027_s12 = scalar_lea.vmem [#allocation9], %s1460_s6 }
  0x5d   : > { %1790 = dma.done.wait (%p1925_p8), %s292_s11, 320  }
  0x5e   : > { %1792 = vsyncadd (%p1925_p8), %s292_s11, 4294966976  ;;  %s1461_s1 = sshll.u32 %s2015_s5, 4  ;;  %s310_s26 = scalar_lea.sflag [#allocation13], %s2015_s5 }
  0x5f   : > { %s304_s24 = scalar_lea.vmem [#allocation11], %s1461_s1  ;;  %s313_s9 = scalar_lea.vmem [#allocation12], %s1461_s1 }
  0x60   : > { %1794 = dma.done.wait (%p1925_p8), %s310_s26, 256  }
  0x61   : > { %1796 = vsyncadd (%p1925_p8), %s310_s26, 4294967040  ;;  %v360_v0 = vlaneseq  ;;  %v1841_v1 = vmov 1966171168   ;;  %v1842_v6 = vmov 0.0   ;;  %v368_v13 = vld [vmem:[%s304_s24] sm:$0xff]  ;;  %v369_v14 = vld [vmem:[%s304_s24 + $0x8] sm:$0xff] }
  0x62   : > { %v558_v2 = vunpack.c.l.s4 %v1841_v1  ;;  %v370_v15 = vld [vmem:[%s313_s9] sm:$0xff]  ;;  %v371_v18 = vld [vmem:[%s313_s9 + $0x8] sm:$0xff]  ;;  %vm941_vm12 = vcmask 1040384   ;;  %vm1845_vm13 = vmmov 1   ;;  %s1846_s13 = smov 499.0   ;;  %s351_s23 = scalar_lea.vmem [#allocation14], %s2015_s5 }
  0x63   : > { %vm2039_vm0 = vcmp.lt.s32.totalorder %v360_v0, 512  ;;  %v388_v4 = vand.u32 127, %v360_v0  ;;  %v2043_v5 = vshrl.u32 %v360_v0, 7  ;;  %v372_v19 = vsub.f32 %v368_v13, %v370_v15  ;;  %v2081_v23 = vld [vmem:[%s2019_s7] sm:$0xff]  ;;  %v2084_v24 = vld [vmem:[%s2019_s7 + $0x8] sm:$0xff]  ;;  %v2090_v27 = vld [vmem:[%s2019_s7 + $0x10] sm:$0xff] }
  0x64   : > { %364 = vst.msk [vmem:[#allocation3] sm:$0xf] %vm2039_vm0, %v1842_v6  ;;  %365 = vst.msk [vmem:[#allocation4] sm:$0xf] %vm2039_vm0, %v1842_v6  ;;  %v559_v8 = vunpack.c.0.s8 %v558_v2  ;;  %v373_v25 = vsub.f32 %v369_v14, %v371_v18  ;;  %v670_v28 = vld [vmem:[%s2019_s7 + $0x18] sm:$0xff]  ;;  %v684_v29 = vrot.slane %v2081_v23, 4 }
  0x65   : > { %v2051_v7 = vadd.s32 384, %v388_v4  ;;  %v2053_v9 = vadd.s32 1920, %v388_v4  ;;  %v2056_v10 = vsub.s32 0, %v2043_v5  ;;  %v2059_v11 = vsub.s32 1, %v2043_v5  ;;  %s2225_s29 = smov 0.0   ;;  %s2227_s22 = smov 0  }
  0x66   : > { %v2062_v12 = vsub.s32 2, %v2043_v5  ;;  %v2065_v16 = vsub.s32 3, %v2043_v5  ;;  %v2068_v17 = vsub.s32 4, %v2043_v5  ;;  %v2072_v20 = vsub.s32 5, %v2043_v5 }
  0x67   : > { %vm666_vm1 = vcmp.lt.s32.totalorder %v2051_v7, 500  ;;  %v2075_v21 = vsub.s32 6, %v2043_v5  ;;  %v2078_v22 = vsub.s32 7, %v2043_v5  ;;  %v2087_v26 = vsub.s32 %v559_v8, %v2043_v5 }
  0x68   : > { %v690_v30 = vrot.slane %v2084_v24, 4  ;;  %v374_v31 = vand.u32 2147483647, %v372_v19  ;;  %v378_v32 = vmul.f32 0.5, %v372_v19  ;;  %vm436_vm2 = vcmp.lt.s32.totalorder %v2053_v9, 2000  ;;  %vm840_vm14 = vmxor %vm666_vm1, %vm1845_vm13 }
  0x69   : > { %v2098_v33 = vsel %vm666_vm1, %v670_v28, 0.0  ;;  %v696_v34 = vrot.slane %v2090_v27, 4  ;;  %v375_v35 = vand.u32 2147483647, %v373_v25  ;;  %v379_v36 = vmul.f32 0.5, %v373_v25 }
  0x6a   : > { %v685_v37 = vmax.f32 %v2081_v23, %v684_v29  ;;  %v691_v38 = vmax.f32 %v2084_v24, %v690_v30  ;;  %vm376_vm3 = vcmp.lt.f32.partialorder %v374_v31, 1.0  ;;  %v380_v39 = vmul.f32 %v378_v32, %v372_v19 }
  0x6b   : > { %v1463_v40 = vadd.f32 -0.5, %v374_v31  ;;  %v697_v41 = vmax.f32 %v2090_v27, %v696_v34  ;;  %vm377_vm4 = vcmp.lt.f32.partialorder %v375_v35, 1.0  ;;  %v381_v42 = vmul.f32 %v379_v36, %v373_v25 }
  0x6c   : > { %v1464_v43 = vadd.f32 -0.5, %v375_v35  ;;  %v686_v44 = vrot.slane %v685_v37, 2  ;;  %v692_v46 = vrot.slane %v691_v38, 2  ;;  %v702_v48 = vrot.slane %v2098_v33, 4 }
  0x6d   : > { %v384_v45 = vsel %vm376_vm3, %v380_v39, %v1463_v40  ;;  %v698_v47 = vrot.slane %v697_v41, 2 }
  0x6e   : > { %v385_v49 = vsel %vm377_vm4, %v381_v42, %v1464_v43  ;;  %v442_v50 = vrot.slane %v384_v45, %v2056_v10  ;;  %v446_v51 = vrot.slane %v384_v45, %v2059_v11  ;;  %v450_v52 = vrot.slane %v384_v45, %v2062_v12 }
  0x6f   : > { %v454_v53 = vrot.slane %v384_v45, %v2065_v16  ;;  %v458_v54 = vrot.slane %v384_v45, %v2068_v17  ;;  %v462_v55 = vrot.slane %v384_v45, %v2072_v20  ;;  %v466_v56 = vrot.slane %v384_v45, %v2075_v21 }
  0x70   : > { %v470_v57 = vrot.slane %v384_v45, %v2078_v22  ;;  %v474_v58 = vrot.slane %v385_v49, %v2056_v10  ;;  %v478_v59 = vrot.slane %v385_v49, %v2059_v11  ;;  %v482_v60 = vrot.slane %v385_v49, %v2062_v12 }
  0x71   : > { %v486_v61 = vrot.slane %v385_v49, %v2065_v16  ;;  %v490_v62 = vrot.slane %v385_v49, %v2068_v17  ;;  %v494_v63 = vrot.slane %v385_v49, %v2072_v20  ;;  %v498_v0 = vrot.slane %v385_v49, %v2075_v21 }
  0x72   : > { %v502_v1 = vrot.slane %v385_v49, %v2078_v22  ;;  %v553_v2 = vcombine.low %v442_v50, %v446_v51  ;;  %v554_v4 = vcombine.low %v450_v52, %v454_v53  ;;  %v555_v8 = vcombine.low %v458_v54, %v462_v55 }
  0x73   : > { %v556_v13 = vcombine.low %v466_v56, %v470_v57  ;;  %v602_v14 = vcombine.low %v474_v58, %v478_v59  ;;  %v603_v15 = vcombine.low %v482_v60, %v486_v61  ;;  %v604_v18 = vcombine.low %v490_v62, %v494_v63 }
  0x74   : > { %v534_v19 = vsel %vm436_vm2, %v502_v1, 0.0  ;;  %v563_v25 = vrot.slane %v553_v2, %v2087_v26  ;;  %v570_v28 = vrot.slane %v554_v4, %v2087_v26  ;;  %v577_v29 = vrot.slane %v555_v8, %v2087_v26 }
  0x75   : > { %v584_v30 = vrot.slane %v556_v13, %v2087_v26  ;;  %v605_v31 = vcombine.low %v498_v0, %v534_v19  ;;  %v612_v32 = vrot.slane %v602_v14, %v2087_v26  ;;  %v619_v34 = vrot.slane %v603_v15, %v2087_v26 }
  0x76   : > { %v585_v35 = vcombine.low %v563_v25, %v570_v28  ;;  %v626_v36 = vrot.slane %v604_v18, %v2087_v26  ;;  %v687_v39 = vmax.f32 %v685_v37, %v686_v44  ;;  %v693_v40 = vmax.f32 %v691_v38, %v692_v46  ;;  %v683_v25 = vld [vmem:[%s2027_s12] sm:$0xf] }
  0x77   : > { %v586_v9 = vcombine.low %v577_v29, %v584_v30  ;;  %v633_v42 = vrot.slane %v605_v31, %v2087_v26  ;;  %v634_v43 = vcombine.low %v612_v32, %v619_v34  ;;  %v699_v45 = vmax.f32 %v697_v41, %v698_v47  ;;  %v908_v32 = vld [vmem:[#allocation3] sm:$0xf] }
  0x78   : > { %v593_v49 = vrot.slane %v585_v35, %v2087_v26  ;;  %v688_v50 = vrot.slane %v687_v39, 1  ;;  %v694_v51 = vrot.slane %v693_v40, 1  ;;  %v703_v52 = vmax.f32 %v2098_v33, %v702_v48 }
  0x79   : > { %v600_v53 = vrot.slane %v586_v9, %v2087_v26  ;;  %v635_v54 = vcombine.low %v626_v36, %v633_v42  ;;  %v642_v55 = vrot.slane %v634_v43, %v2087_v26  ;;  %v700_v56 = vrot.slane %v699_v45, 1 }
  0x7a   : > { %v2135_v57 = vmax.f32 %v687_v39, %v688_v50  ;;  %v2137_v37 = vmax.f32 %v693_v40, %v694_v51  ;;  %v704_v38 = vrot.slane %v703_v52, 2  ;;  %v1843_v47 = vmov 0  }
  0x7b   : > { %v601_v44 = vcombine.low %v593_v49, %v600_v53  ;;  %v649_v41 = vrot.slane %v635_v54, %v2087_v26  ;;  %v2140_v46 = vmax.f32 %v699_v45, %v700_v56  ;;  %v674_v48 = vsel %vm666_vm1, 1, %v1843_v47 }
  0x7c   : > { %v705_v58 = vmax.f32 %v703_v52, %v704_v38  ;;  %v708_v59 = vsub.f32 %v2081_v23, %v2135_v57  ;;  %v709_v60 = vsub.f32 %v2084_v24, %v2137_v37  ;;  %v1844_v63 = vmov 1  }
  0x7d   : > { %v650_v61 = vcombine.low %v642_v55, %v649_v41  ;;  %v710_v62 = vsub.f32 %v2090_v27, %v2140_v46  ;;  %v811_v0 = vcombine.low %v1844_v63, %v1844_v63  ;;  %655 = vst [vmem:[#allocation5] sm:$0xff] %v601_v44  ;;  %v812_v13 = vcombine.low %v1844_v63, %v674_v48 }
  0x7e   : > { %v706_v1 = vrot.slane %v705_v58, 1  ;;  %v712_v2 = vmul.f32 1.442695, %v708_v59  ;;  %v714_v4 = vmul.f32 1.442695, %v709_v60  ;;  %v761_v30 = vrot.slane %v683_v25, %v2056_v10 }
  0x7f   : > { %v716_v8 = vmul.f32 1.442695, %v710_v62  ;;  %656 = vst [vmem:[#allocation5 + $0x8] sm:$0xff] %v650_v61  ;;  %v819_v15 = vrot.slane %v811_v0, %v2087_v26  ;;  %v826_v19 = vrot.slane %v812_v13, %v2087_v26  ;;  %vm810_vm5 = vcmp.gt.s32.totalorder %v683_v25, 0 }
  0x80   : > { %v2151_v14 = vmax.f32 %v705_v58, %v706_v1  ;;  %1595 = vpow2.f32 %v712_v2  ;;  %v765_v34 = vrot.slane %v683_v25, %v2059_v11  ;;  %v769_v36 = vrot.slane %v683_v25, %v2062_v12 }
  0x81   : > { %1597 = vpow2.f32 %v714_v4  ;;  %v827_v29 = vcombine.low %v819_v15, %v826_v19  ;;  %v773_v39 = vrot.slane %v683_v25, %v2065_v16  ;;  %vm774_vm8 = vcmp.eq.s32.totalorder %v2043_v5, %v761_v30 }
  0x82   : > { %v711_v18 = vsub.f32 %v2098_v33, %v2151_v14  ;;  %1599 = vpow2.f32 %v716_v8  ;;  %vm775_vm9 = vcmp.eq.s32.totalorder %v2043_v5, %v765_v34  ;;  %v778_v49 = vsel %vm774_vm8, %v2081_v23, 0.0 }
  0x83   : > { %v834_v31 = vrot.slane %v827_v29, %v2087_v26  ;;  %vm776_vm10 = vcmp.eq.s32.totalorder %v2043_v5, %v769_v36  ;;  %vm777_vm11 = vcmp.eq.s32.totalorder %v2043_v5, %v773_v39  ;;  %v779_v55 = vsel %vm775_vm9, %v2084_v24, 0.0 }
  0x84   : > { %v718_v28 = vmul.f32 1.442695, %v711_v18  ;;  %v782_v56 = vrot.slane %v778_v49, 4  ;;  %v780_v41 = vsel %vm776_vm10, %v2090_v27, 0.0  ;;  %v781_v23 = vsel %vm777_vm11, %v2098_v33, 0.0 }
  0x85   : > { %vm835_vm6 = vcmp.ne.s32.totalorder %v834_v31, 0  ;;  %v788_v62 = vrot.slane %v779_v55, 4  ;;  %v794_v0 = vrot.slane %v780_v41, 4  ;;  %v800_v1 = vrot.slane %v781_v23, 4 }
  0x86   : > { %1601 = vpow2.f32 %v718_v28  ;;  %vm2161_vm7 = vmand %vm810_vm5, %vm835_vm6  ;;  %v783_v63 = vadd.f32 %v782_v56, %v778_v49 }
  0x87   : > { %v1465_v40 = vsel %vm2161_vm7, 1.0, %v1842_v6  ;;  %v789_v31 = vadd.f32 %v788_v62, %v779_v55 }
  0x88   : > { %v911_v9 = vadd.f32 %v1465_v40, %v908_v32 }
  0x8a   : > { %912 = vst.msk [vmem:[#allocation3] sm:$0xf] %vm2039_vm0, %v911_v9  ;;  %v795_v9 = vadd.f32 %v794_v0, %v780_v41 }
  0x8c   : > { %v796_v55 = vrot.slane %v795_v9, 2 }
  0x8d   : > { %v1596_v42 = vpop.eup %1595 }
  0x8e   : > { %v1598_v43 = vpop.eup %1597  ;;  %v720_v45 = vrot.slane %v1596_v42, 4 }
  0x8f   : > { %v1600_v50 = vpop.eup %1599  ;;  %v726_v51 = vrot.slane %v1598_v43, 4 }
  0x90   : > { %v721_v52 = vadd.f32 %v1596_v42, %v720_v45  ;;  %v732_v53 = vrot.slane %v1600_v50, 4  ;;  %v784_v45 = vrot.slane %v783_v63, 2 }
  0x91   : > { %v727_v54 = vadd.f32 %v1598_v43, %v726_v51  ;;  %v919_v2 = vld [vmem:[#allocation3] sm:$0xf] }
  0x92   : > { %v722_v38 = vrot.slane %v721_v52, 2  ;;  %v733_v44 = vadd.f32 %v1600_v50, %v732_v53  ;;  %v924_v13 = vrot.slane %v919_v2, %v2056_v10  ;;  %v928_v33 = vrot.slane %v919_v2, %v2059_v11 }
  0x93   : > { %v1602_v48 = vpop.eup %1601  ;;  %v728_v58 = vrot.slane %v727_v54, 2  ;;  %v932_v15 = vrot.slane %v919_v2, %v2062_v12  ;;  %v936_v18 = vrot.slane %v919_v2, %v2065_v16  ;;  %v790_v50 = vrot.slane %v789_v31, 2 }
  0x94   : > { %v723_v59 = vadd.f32 %v722_v38, %v721_v52  ;;  %v734_v60 = vrot.slane %v733_v44, 2  ;;  %v738_v61 = vrot.slane %v1602_v48, 4  ;;  %v942_v29 = vsel %vm941_vm12, %v924_v13, 0.0 }
  0x95   : > { %v729_v5 = vadd.f32 %v728_v58, %v727_v54  ;;  %v943_v32 = vsel %vm941_vm12, %v928_v33, 0.0  ;;  %v945_v34 = vsel %vm941_vm12, %v932_v15, 0.0  ;;  %v947_v42 = vsel %vm941_vm12, %v936_v18, 0.0 }
  0x96   : > { %v724_v24 = vrot.slane %v723_v59, 1  ;;  %v735_v4 = vadd.f32 %v734_v60, %v733_v44  ;;  %v739_v8 = vadd.f32 %v1602_v48, %v738_v61  ;;  %v944_v40 = vadd.f32 %v943_v32, %v942_v29 }
  0x97   : > { %v730_v27 = vrot.slane %v729_v5, 1  ;;  %v801_v52 = vadd.f32 %v800_v1, %v781_v23  ;;  %v785_v54 = vadd.f32 %v784_v45, %v783_v63  ;;  %v791_v56 = vadd.f32 %v790_v50, %v789_v31 }
  0x98   : > { %v725_v19 = vadd.f32 %v724_v24, %v723_v59  ;;  %v736_v25 = vrot.slane %v735_v4, 1  ;;  %v740_v28 = vrot.slane %v739_v8, 2  ;;  %v946_v49 = vadd.f32 %v945_v34, %v944_v40 }
  0x99   : > { %v731_v30 = vadd.f32 %v730_v27, %v729_v5  ;;  %v802_v38 = vrot.slane %v801_v52, 2  ;;  %v844_v44 = vsel %vm840_vm14, 1, %v1843_v47  ;;  %v786_v41 = vrot.slane %v785_v54, 1 }
  0x9a   : > { %v737_v36 = vadd.f32 %v736_v25, %v735_v4  ;;  %v741_v39 = vadd.f32 %v740_v28, %v739_v8  ;;  %1603 = vlog2.f32 %v725_v19  ;;  %v948_v53 = vadd.f32 %v947_v42, %v946_v49  ;;  %v913_v42 = vld [vmem:[#allocation4] sm:$0xf] }
  0x9b   : > { %1605 = vlog2.f32 %v731_v30  ;;  %v797_v48 = vadd.f32 %v796_v55, %v795_v9  ;;  %v792_v58 = vrot.slane %v791_v56, 1  ;;  %v845_v59 = vcombine.low %v1843_v47, %v1843_v47 }
  0x9c   : > { %v742_v43 = vrot.slane %v741_v39, 1  ;;  %1607 = vlog2.f32 %v737_v36  ;;  %949 = vadd.xlane.f32.xlu0 %v948_v53  ;;  %v803_v23 = vadd.f32 %v802_v38, %v801_v52  ;;  %v846_v60 = vcombine.low %v1843_v47, %v844_v44 }
  0x9d   : > { %v787_v63 = vadd.f32 %v786_v41, %v785_v54  ;;  %v798_v7 = vrot.slane %v797_v48, 1  ;;  %v793_v2 = vadd.f32 %v792_v58, %v791_v56  ;;  %v853_v24 = vrot.slane %v845_v59, %v2087_v26 }
  0x9e   : > { %v743_v51 = vadd.f32 %v742_v43, %v741_v39  ;;  %v804_v13 = vrot.slane %v803_v23, 1  ;;  %v860_v27 = vrot.slane %v846_v60, %v2087_v26 }
  0x9f   : > { %v799_v15 = vadd.f32 %v798_v7, %v797_v48 }
  0xa0   : > { %1609 = vlog2.f32 %v743_v51  ;;  %v805_v29 = vadd.f32 %v804_v13, %v803_v23  ;;  %v861_v30 = vcombine.low %v853_v24, %v860_v27 }
  0xa7   : > { %v1604_v61 = vpop.eup %1603 }
  0xa8   : > { %v1606_v62 = vpop.eup %1605  ;;  %v745_v5 = vmul.f32 0.6931472, %v1604_v61 }
  0xa9   : > { %v1608_v0 = vpop.eup %1607  ;;  %v747_v1 = vmul.f32 0.6931472, %v1606_v62 }
  0xaa   : > { %v749_v4 = vmul.f32 0.6931472, %v1608_v0  ;;  %v752_v8 = vadd.f32 %v745_v5, %v2135_v57  ;;  %v868_v57 = vrot.slane %v861_v30, %v2087_v26 }
  0xab   : > { %v753_v33 = vadd.f32 %v747_v1, %v2137_v37 }
  0xac   : > { %v754_v47 = vadd.f32 %v749_v4, %v2140_v46  ;;  %v806_v18 = vsub.f32 %v752_v8, %v787_v63  ;;  %vm869_vm15 = vcmp.ne.s32.totalorder %v868_v57, 0 }
  0xad   : > { %v1610_v19 = vpop.eup %1609  ;;  %v807_v25 = vsub.f32 %v753_v33, %v793_v2  ;;  %vm870_vm1 = vmor %vm2161_vm7, %vm869_vm15 }
  0xae   : > { %v751_v28 = vmul.f32 0.6931472, %v1610_v19  ;;  %v808_v32 = vsub.f32 %v754_v47, %v799_v15 }
  0xaf   : > { %v875_v34 = vcombine.low %v806_v18, %v807_v25 }
  0xb0   : > { %v755_v31 = vadd.f32 %v751_v28, %v2151_v14 }
  0xb1   : > { %v883_v40 = vrot.slane %v875_v34, %v2087_v26 }
  0xb2   : > { %v809_v36 = vsub.f32 %v755_v31, %v805_v29 }
  0xb4   : > { %v876_v39 = vcombine.low %v808_v32, %v809_v36 }
  0xb6   : > { %v890_v37 = vrot.slane %v876_v39, %v2087_v26 }
  0xb8   : > { %v891_v46 = vcombine.low %v883_v40, %v890_v37 }
  0xba   : > { %v898_v9 = vrot.slane %v891_v46, %v2087_v26 }
  0xbc   : > { %v900_v43 = vsel %vm870_vm1, 0.0, %v898_v9 }
  0xbd   : > { %907 = vst.msk [vmem:[#allocation2] sm:$0xf] %vm2039_vm0, %v900_v43  ;;  %v914_v14 = vmax.f32 %v913_v42, %v900_v43 }
  0xbf   : > { %915 = vst.msk [vmem:[#allocation4] sm:$0xf] %vm2039_vm0, %v914_v14 }
  0xc4   : > { %v2210_v45 = vld [vmem:[#allocation2] sm:$0xf] }
  0xc6   : > { %v961_v49 = vld [vmem:[#allocation4] sm:$0xf] }
  0xc7   : > { %v966_v50 = vrot.slane %v961_v49, %v2056_v10  ;;  %v970_v51 = vrot.slane %v961_v49, %v2059_v11  ;;  %v974_v35 = vrot.slane %v961_v49, %v2062_v12  ;;  %v978_v26 = vrot.slane %v961_v49, %v2065_v16 }
  0xc9   : > { %v983_v52 = vsel %vm941_vm12, %v966_v50, -inf  ;;  %v984_v53 = vsel %vm941_vm12, %v970_v51, -inf  ;;  %v985_v54 = vsel %vm941_vm12, %v974_v35, -inf  ;;  %v986_v3 = vsel %vm941_vm12, %v978_v26, -inf }
  0xca   : > { %v987_v55 = vmax.f32 %v983_v52, %v984_v53  ;;  %v988_v56 = vmax.f32 %v985_v54, %v986_v3 }
  0xcc   : > { %v989_v38 = vmax.f32 %v987_v55, %v988_v56 }
  0xce   : > { %990 = vmax.xlane.f32.xlu0 %v989_v38 }
 0x125   : > { %v950_v44 = vpop.xlane.xlu0 %949 }
 0x126   : > { %v951_v41 = vrot.slane %v950_v44, 4 }
 0x128   : > { %v952_v48 = vadd.f32 %v951_v41, %v950_v44 }
 0x12a   : > { %v953_v58 = vrot.slane %v952_v48, 2 }
 0x12c   : > { %v954_v59 = vadd.f32 %v953_v58, %v952_v48 }
 0x12e   : > { %v955_v23 = vrot.slane %v954_v59, 1 }
 0x130   : > { %v956_v60 = vadd.f32 %v955_v23, %v954_v59 }
 0x132   : > { %1475 = vpush %v956_v60 }
 0x157   : > { %v991_v61 = vpop.xlane.xlu0 %990 }
 0x158   : > { %v992_v62 = vrot.slane %v991_v61, 4 }
 0x15a   : > { %v993_v5 = vmax.f32 %v991_v61, %v992_v62 }
 0x15c   : > { %v994_v63 = vrot.slane %v993_v5, 2 }
 0x15e   : > { %v995_v7 = vmax.f32 %v993_v5, %v994_v63 }
 0x160   : > { %v996_v0 = vrot.slane %v995_v7, 1 }
 0x162   : > { %v997_v1 = vmax.f32 %v995_v7, %v996_v0 }
 0x163   : > { %s1476_s21 = spop %1475 }
 0x164   : > { %1477 = vpush %v997_v1  ;;  %s958_s27 = smul.f32 3.0, %s1476_s21 }
 0x166   : > { %s2220_s25 = smin.f32 %s1846_s13, %s958_s27 }
 0x195   : > { %s1478_s0 = spop %1477 }
 0x196   : > { %s999_s14 = sadd.f32 1.0, %s1478_s0  }
 0x197 LB: >> { %s1008_s10 = sadd.f32 %s1827_s14, %s1831_s29  ;;  %v1847_v24 = vmov 0.0   ;;  %s1005_s22 = sadd.s32 1, %s1835_s22   ;;  %s1835_s22 = sphi %s2227_s22, %s1005_s22   ;;  %s1831_s29 = sphi %s2225_s29, %s2388_s29   ;;  %s1827_s14 = sphi %s999_s14, %s2387_s14  }
 0x198   : >> { %p1002_p0 = scmp.ge.s32.totalorder %s1005_s22, 26  }
 0x199   : >> { %s1009_s7 = smul.f32 0.5, %s1008_s10  ;;  %v1136_v37 = vld [vmem:[#allocation5] sm:$0xff] (%p1002_p0)  ;;  %s1468_s9 = sshll.u32 (%p1002_p0), %s1815_s18, 4 }
 0x19a   : > { %v1143_v26 = vrot.slane (%p1002_p0), %v1136_v37, %v2056_v10  ;;  %v1147_v41 = vrot.slane (%p1002_p0), %v1136_v37, %v2059_v11  ;;  %v1151_v48 = vrot.slane (%p1002_p0), %v1136_v37, %v2062_v12  ;;  %v1155_v60 = vrot.slane (%p1002_p0), %v1136_v37, %v2065_v16  ;;  %s1277_s27 = sshll.u32 (%p1002_p0), %s351_s23, 4  ;;  %s2321_s10 = scalar_lea.hbm (%p1002_p0), %s2369_s4, %s1468_s9  ;;  %s1278_s27 = int_to_ptr.vmem [resolvable:$true] %s1277_s27 }
 0x19b   : >> { %v1010_v2 = vstv %s1009_s7  ;;  %v1159_v62 = vrot.slane (%p1002_p0), %v1136_v37, %v2068_v17  ;;  %s1848_s18 = smov (%p1002_p0), [#allocation14]  }
 0x19c   : >> { %vm1011_vm0 = vcmp.ge.f32.partialorder %v2210_v45, %v1010_v2  ;;  %v1220_v5 = vsel (%p1002_p0), %vm941_vm12, %v1143_v26, 0.0  ;;  %v1221_v63 = vsel (%p1002_p0), %vm941_vm12, %v1147_v41, 0.0  ;;  %v1223_v7 = vsel (%p1002_p0), %vm941_vm12, %v1151_v48, 0.0 }
 0x19d   : >> { %v1466_v4 = vsel %vm1011_vm0, 1.0, %v1847_v24  ;;  %v1222_v1 = vadd.f32 (%p1002_p0), %v1221_v63, %v1220_v5  ;;  %v1163_v2 = vrot.slane (%p1002_p0), %v1136_v37, %v2072_v20  ;;  %v1225_v24 = vsel (%p1002_p0), %vm941_vm12, %v1155_v60, 0.0 }
 0x19e   : >> { %v1018_v8 = vrot.slane %v1466_v4, %v2056_v10  ;;  %v1022_v13 = vrot.slane %v1466_v4, %v2059_v11  ;;  %v1026_v27 = vrot.slane %v1466_v4, %v2062_v12  ;;  %v1030_v33 = vrot.slane %v1466_v4, %v2065_v16 }
 0x19f   : > { %v1224_v4 = vadd.f32 (%p1002_p0), %v1223_v7, %v1222_v1 }
 0x1a0   : >> { %v1035_v47 = vsel %vm941_vm12, %v1018_v8, 0.0  ;;  %v1036_v15 = vsel %vm941_vm12, %v1022_v13, 0.0  ;;  %v1038_v18 = vsel %vm941_vm12, %v1026_v27, 0.0  ;;  %v1040_v25 = vsel %vm941_vm12, %v1030_v33, 0.0  ;;  %v1137_v27 = vld [vmem:[#allocation5 + $0x8] sm:$0xff] (%p1002_p0) }
 0x1a1   : >> { %v1037_v19 = vadd.f32 %v1036_v15, %v1035_v47  ;;  %v1167_v8 = vrot.slane (%p1002_p0), %v1136_v37, %v2075_v21  ;;  %v1227_v13 = vsel (%p1002_p0), %vm941_vm12, %v1159_v62, 0.0  ;;  %v1226_v33 = vadd.f32 (%p1002_p0), %v1225_v24, %v1224_v4 }
 0x1a2   : > { %v1171_v47 = vrot.slane (%p1002_p0), %v1136_v37, %v2078_v22  ;;  %v1229_v15 = vsel (%p1002_p0), %vm941_vm12, %v1163_v2, 0.0 }
 0x1a3   : >> { %v1039_v28 = vadd.f32 %v1038_v18, %v1037_v19  ;;  %v1228_v18 = vadd.f32 (%p1002_p0), %v1227_v13, %v1226_v33  ;;  %v1175_v19 = vrot.slane (%p1002_p0), %v1137_v27, %v2056_v10 }
 0x1a5   : >> { %v1041_v29 = vadd.f32 %v1040_v25, %v1039_v28  ;;  %v1231_v25 = vsel (%p1002_p0), %vm941_vm12, %v1167_v8, 0.0  ;;  %v1230_v28 = vadd.f32 (%p1002_p0), %v1229_v15, %v1228_v18 }
 0x1a7   : >> { %1042 = vadd.xlane.f32.xlu0 %v1041_v29  ;;  %v1179_v29 = vrot.slane (%p1002_p0), %v1137_v27, %v2059_v11 }
 0x230   : >> { %v1043_v30 = vpop.xlane.xlu0 %1042 }
 0x231   : >> { %v1044_v31 = vrot.slane %v1043_v30, 4 }
 0x233   : >> { %v1045_v32 = vadd.f32 %v1044_v31, %v1043_v30  ;;  %v1233_v30 = vsel (%p1002_p0), %vm941_vm12, %v1171_v47, 0.0  ;;  %v1232_v31 = vadd.f32 (%p1002_p0), %v1231_v25, %v1230_v28 }
 0x235   : >> { %v1046_v34 = vrot.slane %v1045_v32, 2 }
 0x237   : >> { %v1047_v36 = vadd.f32 %v1046_v34, %v1045_v32  ;;  %v1183_v32 = vrot.slane (%p1002_p0), %v1137_v27, %v2062_v12  ;;  %v1235_v34 = vsel (%p1002_p0), %vm941_vm12, %v1175_v19, 0.0 }
 0x239   : >> { %v1048_v57 = vrot.slane %v1047_v36, 1  ;;  %v1239_v37 = vsel (%p1002_p0), %vm941_vm12, %v1183_v32, 0.0 }
 0x23b   : >> { %v1049_v39 = vadd.f32 %v1048_v57, %v1047_v36  ;;  %v1234_v36 = vadd.f32 (%p1002_p0), %v1233_v30, %v1232_v31  ;;  %v1187_v57 = vrot.slane (%p1002_p0), %v1137_v27, %v2065_v16 }
 0x23d   : >> { %1479 = vpush %v1049_v39  ;;  %v1237_v39 = vsel (%p1002_p0), %vm941_vm12, %v1179_v29, 0.0 }
 0x26e   : >> { %s1480_s8 = spop %1479 }
 0x26f   : >> { %p1051_p8 = scmp.ge.f32.partialorder %s1480_s8, %s2220_s25  ;;  %s1727_s8 = sshll.u32 (%p1002_p0), %s1848_s18, 4  ;;  %s1728_s8 = int_to_ptr.vmem [resolvable:$false] %s1727_s8 }
 0x270   : > { %1004 = sbr.rel (!%p1002_p0) target bundleno = 407 (0x197), region = 134  ;;  %p1730_p10 = scmp.lt.s32.totalorder (%p1002_p0), %s1278_s27, %s1728_s8 }
 0x271   : >> { %s2251_s6 = scalar_select %p1051_p8, %s1009_s7, %s1831_s29  }
 0x272   : >> { %s1053_s11 = scalar_select %p1051_p8, %s1827_s14, %s1009_s7  }
 0x273   : >> { %s2388_s29 = smov %s2251_s6  ;;  %s1723_s7 = scalar_lea.vmem (%p1002_p0), %s1278_s27, 16 }
 0x274   : >> { %s2387_s14 = smov %s1053_s11  ;;  %v1054_v40 = vstv (%p1002_p0), %s1053_s11  ;;  %p1724_p3 = scmp.ne.s32.totalorder (%p1002_p0), %s1278_s27, %s1723_s7 }
 0x275   : > { %vm1055_vm2 = vcmp.ge.f32.partialorder %v2210_v45, %v1054_v40  ;;  %v1236_v40 = vadd.f32 %v1235_v34, %v1234_v36 }
 0x276   : > { %v1467_v46 = vsel %vm1055_vm2, 1.0, %v1842_v6  ;;  %v1095_v9 = vsel %vm1055_vm2, %v2210_v45, 0.0  ;;  %p1725_p4 = pnand %p1724_p3, %p1929_p9 }
 0x277   : > { %v1062_v42 = vrot.slane %v1467_v46, %v2056_v10  ;;  %v1066_v43 = vrot.slane %v1467_v46, %v2059_v11  ;;  %v1070_v14 = vrot.slane %v1467_v46, %v2062_v12  ;;  %v1074_v49 = vrot.slane %v1467_v46, %v2065_v16 }
 0x278   : > { %v1100_v50 = vrot.slane %v1095_v9, %v2056_v10  ;;  %v1104_v51 = vrot.slane %v1095_v9, %v2059_v11  ;;  %v1108_v35 = vrot.slane %v1095_v9, %v2062_v12  ;;  %v1112_v53 = vrot.slane %v1095_v9, %v2065_v16  ;;  %p1726_p7 = pneg %p1725_p4 }
 0x279   : > { %v1079_v6 = vsel %vm941_vm12, %v1062_v42, 0.0  ;;  %v1080_v45 = vsel %vm941_vm12, %v1066_v43, 0.0  ;;  %v1082_v52 = vsel %vm941_vm12, %v1070_v14, 0.0  ;;  %v1084_v38 = vsel %vm941_vm12, %v1074_v49, 0.0 }
 0x27a   : > { %v1081_v54 = vadd.f32 %v1080_v45, %v1079_v6  ;;  %v1117_v3 = vsel %vm941_vm12, %v1100_v50, 0.0  ;;  %v1118_v55 = vsel %vm941_vm12, %v1104_v51, 0.0  ;;  %v1120_v56 = vsel %vm941_vm12, %v1108_v35, 0.0 }
 0x27b   : > { %v1119_v44 = vadd.f32 %v1118_v55, %v1117_v3  ;;  %v1122_v23 = vsel %vm941_vm12, %v1112_v53, 0.0  ;;  %v1191_v10 = vrot.slane %v1137_v27, %v2068_v17  ;;  %v1238_v46 = vadd.f32 %v1237_v39, %v1236_v40 }
 0x27c   : > { %v1083_v58 = vadd.f32 %v1082_v52, %v1081_v54  ;;  %v1195_v11 = vrot.slane %v1137_v27, %v2072_v20  ;;  %v1241_v9 = vsel %vm941_vm12, %v1187_v57, 0.0  ;;  %v1199_v12 = vrot.slane %v1137_v27, %v2075_v21 }
 0x27d   : > { %v1121_v59 = vadd.f32 %v1120_v56, %v1119_v44  ;;  %v1240_v42 = vadd.f32 %v1239_v37, %v1238_v46  ;;  %v1243_v43 = vsel %vm941_vm12, %v1191_v10, 0.0  ;;  %v1203_v16 = vrot.slane %v1137_v27, %v2078_v22 }
 0x27e   : > { %v1085_v61 = vadd.f32 %v1084_v38, %v1083_v58  ;;  %v1245_v49 = vsel %vm941_vm12, %v1195_v11, 0.0  ;;  %v1247_v17 = vsel %vm941_vm12, %v1199_v12, 0.0 }
 0x27f   : > { %v1123_v0 = vadd.f32 %v1122_v23, %v1121_v59  ;;  %v1242_v14 = vadd.f32 %v1241_v9, %v1240_v42  ;;  %v1249_v35 = vsel %vm941_vm12, %v1203_v16, 0.0 }
 0x280   : > { %1086 = vadd.xlane.f32.xlu0 %v1085_v61 }
 0x281   : > { %v1244_v50 = vadd.f32 %v1243_v43, %v1242_v14 }
 0x283   : > { %v1246_v51 = vadd.f32 %v1245_v49, %v1244_v50 }
 0x284   : > { %1124 = vadd.xlane.f32.xlu0 %v1123_v0 }
 0x285   : > { %v1248_v26 = vadd.f32 %v1247_v17, %v1246_v51 }
 0x287   : > { %v1250_v20 = vadd.f32 %v1249_v35, %v1248_v26 }
 0x289   : > { %1251 = vadd.xlane.f32.xlu1 %v1250_v20 }
 0x309   : > { %v1087_v6 = vpop.xlane.xlu0 %1086 }
 0x30a   : > { %v1088_v45 = vrot.slane %v1087_v6, 4 }
 0x30c   : > { %v1089_v52 = vadd.f32 %v1088_v45, %v1087_v6 }
 0x30d   : > { %v1125_v21 = vpop.xlane.xlu0 %1124 }
 0x30e   : > { %v1090_v53 = vrot.slane %v1089_v52, 2  ;;  %v1126_v54 = vrot.slane %v1125_v21, 4 }
 0x310   : > { %v1127_v3 = vadd.f32 %v1126_v54, %v1125_v21  ;;  %v1091_v55 = vadd.f32 %v1090_v53, %v1089_v52 }
 0x312   : > { %v1128_v22 = vrot.slane %v1127_v3, 2  ;;  %v1092_v56 = vrot.slane %v1091_v55, 1  ;;  %v1252_v58 = vpop.xlane.xlu1 %1251 }
 0x313   : > { %v1253_v59 = vrot.slane %v1252_v58, 4 }
 0x314   : > { %v1129_v38 = vadd.f32 %v1128_v22, %v1127_v3  ;;  %v1093_v44 = vadd.f32 %v1092_v56, %v1091_v55 }
 0x315   : > { %v1254_v23 = vadd.f32 %v1253_v59, %v1252_v58 }
 0x316   : > { %1481 = vpush %v1093_v44  ;;  %v1130_v41 = vrot.slane %v1129_v38, 1 }
 0x317   : > { %v1255_v60 = vrot.slane %v1254_v23, 2 }
 0x318   : > { %v1131_v48 = vadd.f32 %v1130_v41, %v1129_v38 }
 0x319   : > { %v1256_v61 = vadd.f32 %v1255_v60, %v1254_v23 }
 0x31a   : > { %1483 = vpush %v1131_v48 }
 0x31b   : > { %v1257_v62 = vrot.slane %v1256_v61, 1 }
 0x31d   : > { %v1258_v5 = vadd.f32 %v1257_v62, %v1256_v61 }
 0x31f   : > { %1485 = vpush %v1258_v5 }
 0x347   : > { %s1482_s12 = spop %1481 }
 0x348   : > { %s1133_s1 = ssub.f32 %s2220_s25, %s1482_s12  ;;  %s1265_s25 = scalar_lea.sflag [#allocation8], %s2015_s5 }
 0x34a   : > { %s1134_s24 = smul.f32 %s1133_s1, %s2251_s6  ;;  %s1729_s6 = scalar_lea.vmem %s1728_s8, 32 }
 0x34b   : > { %s1484_s26 = spop %1483  ;;  %p1731_p13 = scmp.lt.s32.totalorder %s1729_s6, %s1723_s7 }
 0x34c   : > { %s1135_s13 = sadd.f32 %s1484_s26, %s1134_s24 }
 0x34d   : > { %p1732_p12 = por %p1731_p13, %p1730_p10 }
 0x34f   : > { %p1733_p5 = pnand %p1732_p12, %p1726_p7 }
 0x350   : > { %s1486_s21 = spop %1485 }
 0x351   : > { %s1260_s0 = smul.f32 0.00025, %s1486_s21 }
 0x353   : > { %s1261_s14 = sadd.f32 %s1260_s0, %s1135_s13 }
 0x355   : > { %v1262_v63 = vstv %s1261_s14 }
 0x356   : > { %1263 = vst [vmem:[%s351_s23] sm:$0x1] %v1262_v63 }
 0x357   : > { %1736 = shalt.err (!%p1733_p5)
}
 0x358   : > { %s1737_s23 = scalar_lea.hbm %s2321_s10, 16  ;;  %s1741_s12 = scalar_lea.hbm %s2369_s4, 32 }
 0x359   : > { %p1738_p1 = scmp.ne.s32.totalorder %s2321_s10, %s1737_s23  ;;  %p1742_p8 = scmp.lt.s32.totalorder %s2321_s10, %s2369_s4 }
 0x35a   : > { %p1743_p0 = scmp.lt.s32.totalorder %s1741_s12, %s1737_s23 }
 0x35b   : > { %p1739_p2 = pnand %p1738_p1, %p1929_p9 }
 0x35c   : > { %p1744_p3 = por %p1743_p0, %p1742_p8 }
 0x35d   : > { %p1740_p6 = pneg %p1739_p2 }
 0x35f   : > { %p1745_p4 = pnand %p1744_p3, %p1740_p6 }
 0x361   : > { %1748 = shalt.err (!%p1745_p4)
}
 0x362   : > { %1495 = dma.vmem_to_hbm [thread:$0]  (%p1929_p9), %s1278_s27, 16, %s2321_s10, %s1265_s25  }
 0x363 PF: > { %s1289_s26 = sand.u32 1, %s1803_s15   ;;  %p2389_p7 = scmp.ge.s32.totalorder %s1823_s20, 2 }
 0x364   : > { %s1290_s9 = scalar_lea.sflag [#allocation8], %s1289_s26 }
 0x365   : > { %p1511_p10 = pnand %p2389_p7, %p1936_p11 }
 0x367   : > { %p1512_p13 = pneg %p1511_p10 }
 0x369   : > { %1798 = dma.done.wait (%p1512_p13), %s1290_s9, 16  }
 0x36a   : > { %1800 = vsyncadd (%p1512_p13), %s1290_s9, 4294967280  ;;  %s26_s20 = sadd.s32 1, %s1823_s20   ;;  %s2390_s28 = sld [smem:[#allocation20_spill]] }
 0x36b   : > { %p23_p12 = scmp.ge.s32.totalorder %s26_s20, 4   ;;  %s2391_s21 = sld [smem:[#allocation19_spill]] }
 0x36c   : > { %s2392_s15 = smov %s1807_s16  ;;  %s2393_s16 = smov %s1811_s17 }
 0x36d   : > { %s2395_s18 = smov %s1819_s19  ;;  %25 = sbr.rel (!%p23_p12) target bundleno = 13 (0xd), region = 145 }
 0x370   : > { %s2394_s17 = smov %s2390_s28 }
 0x371   : > { %s2396_s19 = smov %s2391_s21 }
 0x372   :  { %1294 = vsyncpa [#allocation7], 1 }
 0x373   :  { %1296 = vsyncpa [#allocation7 + $0x1], 1 }
 0x374   :  { %1297 = vsyncpa [#allocation10], 1 }
 0x375   :  { %1299 = vsyncpa [#allocation10 + $0x1], 1 }
 0x376   :  { %1300 = vsyncpa [#allocation13], 1 }
 0x377   :  { %1302 = vsyncpa [#allocation13 + $0x1], 1 }
 0x378   :  { %1303 = vsyncpa [#allocation8], 1 }
 0x379   :  { %1305 = vsyncpa [#allocation8 + $0x1], 1 }

</bundles_post_ra>
